<compile_context>
chip_gen: v5e
topology: v5e:2x2
jax: 0.10.0
libtpu: 0.0.40
codegen_flags: <defaults>
</compile_context>

<pallas_src>
import functools

import jax
import jax.numpy as jnp
from jax.experimental import pallas as pl
from jax.experimental.pallas import tpu as pltpu


def _round_up(x, m):
    return (x + m - 1) // m * m


# ---------------------------------------------------------------------------
# Pass 1: Conv3d(k=3, s=1, p=1) + bias for one depth plane, plus per-plane
# partial sums for the InstanceNorm statistics.
# ---------------------------------------------------------------------------
def _conv_stats_kernel(mask_ref, w_ref, b_ref, x0_ref, x1_ref, x2_ref,
                       y_ref, ps_ref, stage_ref, *, cin, hwq, wp):
    # mask_ref : (1, hwq)          f32   1.0 at valid output lanes
    # w_ref    : (Cout, 27*cin)    bf16  taps folded into the contraction dim
    # b_ref    : (Cout, 1)         f32   conv bias
    # x*_ref   : (1, 1, cin, L_in) bf16  padded input planes d+0 / d+1 / d+2
    # y_ref    : (1, 1, Cout, hwq)       conv + bias output (pre-norm)
    # ps_ref   : (1, 1, Cout, 2)   f32   per-plane [sum, sum of squares]
    # stage_ref: (27*cin, hwq)     bf16  staged operand (VMEM scratch)
    plane_offsets = tuple(dy * wp + dx for dy in range(3) for dx in range(3))

    # Build the staged operand: 27 statically-offset copies stacked on the
    # contraction (sublane) axis.  dz shifts arrive via the three BlockSpecs,
    # so only the 9 small in-plane offsets are sliced here.
    for dz, xr in enumerate((x0_ref, x1_ref, x2_ref)):
        for j, off in enumerate(plane_offsets):
            r = (dz * 9 + j) * cin
            stage_ref[r:r + cin, :] = xr[0, 0, :, off:off + hwq]

    # One MXU matmul, K = 27*Cin, bf16 operands, f32 accumulation.  The result
    # stays in registers; a single cast+store below (no VMEM accumulator RMW).
    y = jnp.dot(w_ref[...], stage_ref[...], preferred_element_type=jnp.float32)
    y = y + b_ref[...]                                      # (Cout, hwq)

    # Single fused pass for the partial statistics (padding lanes excluded).
    ym = jnp.where(mask_ref[...] > 0.5, y, 0.0)
    ps_ref[0, 0, :, 0:1] = jnp.sum(ym, axis=1, keepdims=True)
    ps_ref[0, 0, :, 1:2] = jnp.sum(ym * y, axis=1, keepdims=True)

    y_ref[0, 0] = y.astype(y_ref.dtype)


# ---------------------------------------------------------------------------
# Pass 2: per-(instance, channel) affine normalization + LeakyReLU.
# ---------------------------------------------------------------------------
def _norm_act_kernel(scale_ref, shift_ref, y_ref, o_ref, *, slope):
    y = y_ref[0].astype(jnp.float32)                        # (td, Cout, hwq)
    z = y * scale_ref[0] + shift_ref[0]                     # (Cout, 1) broadcast
    o_ref[0] = jnp.where(z >= 0.0, z, slope * z).astype(o_ref.dtype)


def conv_block_forward(x, weight, bias, gamma, beta, *,
                       eps=1e-5, negative_slope=0.01,
                       intermediate_dtype=jnp.float32):
    """ConvBlock forward: x (B,Cin,D,H,W), weight (Cout,Cin,3,3,3) -> (B,Cout,D,H,W)."""
    B, Cin, D, H, W = x.shape
    Cout, Cin_w, KD, KH, KW = weight.shape
    assert (Cin_w, KD, KH, KW) == (Cin, 3, 3, 3), \
        "only the module-default kernel=3 / stride=1 path is implemented"

    Dp, Hp, Wp = D + 2, H + 2, W + 2
    hwp = Hp * Wp
    hwq = _round_up(hwp, 128)            # lane-dense plane width (unmasked vst)
    l_in = hwq + 2 * Wp + 2              # keeps every in-plane tap slice in-bounds

    # --- input layout: (B, Dp, Cin, l_in) bf16, depth-plane major, so each dz
    #     tap is a plain BlockSpec plane fetch.  Cast to bf16 first (half DMA).
    xb = x.astype(jnp.bfloat16)
    xb = jnp.pad(xb, ((0, 0), (0, 0), (1, 1), (1, 1), (1, 1)))
    xb = jnp.transpose(xb, (0, 2, 1, 3, 4)).reshape(B, Dp, Cin, hwp)
    xb = jnp.pad(xb, ((0, 0), (0, 0), (0, 0), (0, l_in - hwp)))

    # --- weights: taps folded into the contraction dim, bf16.
    #     column index = ((dz*3 + dy)*3 + dx)*Cin + cin  (matches stage rows).
    w2d = jnp.transpose(weight, (0, 2, 3, 4, 1)).reshape(Cout, 27 * Cin)
    w2d = w2d.astype(jnp.bfloat16)
    b2d = bias.reshape(Cout, 1).astype(jnp.float32)

    # --- tiny (one plane) validity mask; resident in VMEM (KB, not MB).
    mask = jnp.zeros((Hp, Wp), jnp.float32).at[:H, :W].set(1.0).reshape(1, hwp)
    mask = jnp.pad(mask, ((0, 0), (0, hwq - hwp)))

    # --- explicit VMEM budget (double-buffered blocks + staging + residents).
    itm = jnp.dtype(intermediate_dtype).itemsize
    x_blk = 3 * Cin * l_in * 2
    y_blk = Cout * hwq * itm
    stage_b = 27 * Cin * hwq * 2
    resident = Cout * 27 * Cin * 2 + Cout * 8 + hwq * 4
    vmem_limit = int(min(max(2 * (2 * x_blk + 2 * y_blk + stage_b + resident)
                             + (8 << 20), 32 << 20), 64 << 20))

    kernel1 = functools.partial(_conv_stats_kernel, cin=Cin, hwq=hwq, wp=Wp)
    y_pre, psums = pl.pallas_call(
        kernel1,
        out_shape=(
            jax.ShapeDtypeStruct((B, D, Cout, hwq), intermediate_dtype),
            jax.ShapeDtypeStruct((B, D, Cout, 2), jnp.float32),
        ),
        grid_spec=pltpu.PrefetchScalarGridSpec(
            num_scalar_prefetch=0,
            grid=(B, D),
            in_specs=[
                pl.BlockSpec((1, hwq), lambda b, d: (0, 0)),            # mask
                pl.BlockSpec((Cout, 27 * Cin), lambda b, d: (0, 0)),    # weights
                pl.BlockSpec((Cout, 1), lambda b, d: (0, 0)),           # bias
                pl.BlockSpec((1, 1, Cin, l_in), lambda b, d: (b, d, 0, 0)),
                pl.BlockSpec((1, 1, Cin, l_in), lambda b, d: (b, d + 1, 0, 0)),
                pl.BlockSpec((1, 1, Cin, l_in), lambda b, d: (b, d + 2, 0, 0)),
            ],
            out_specs=[
                pl.BlockSpec((1, 1, Cout, hwq), lambda b, d: (b, d, 0, 0)),
                pl.BlockSpec((1, 1, Cout, 2), lambda b, d: (b, d, 0, 0)),
            ],
            scratch_shapes=[pltpu.VMEM((27 * Cin, hwq), jnp.bfloat16)],
        ),
        compiler_params=pltpu.CompilerParams(
            dimension_semantics=("parallel", "parallel"),
            vmem_limit_bytes=vmem_limit,
        ),
    )(mask, w2d, b2d, xb, xb, xb)

    # --- reduce partial sums -> InstanceNorm3d statistics (biased variance),
    #     all in f32 (tiny (B, Cout) arrays).
    n_valid = float(D * H * W)
    s1 = jnp.sum(psums[:, :, :, 0], axis=1)                 # (B, Cout)
    s2 = jnp.sum(psums[:, :, :, 1], axis=1)
    mean = s1 / n_valid
    var = jnp.maximum(s2 / n_valid - mean * mean, 0.0)
    rstd = jax.lax.rsqrt(var + eps)
    sc = gamma[None, :].astype(jnp.float32) * rstd          # (B, Cout)
    sh = beta[None, :].astype(jnp.float32) - mean * sc
    scale = sc[:, :, None]                                  # (B, Cout, 1)
    shift = sh[:, :, None]

    # --- pass 2: normalize + LeakyReLU, td planes per step (memory-bound).
    td = 1
    for cand in range(D, 0, -1):
        if D % cand == 0 and cand * Cout * hwq * (itm + x.dtype.itemsize) <= (8 << 20):
            td = cand
            break

    kernel2 = functools.partial(_norm_act_kernel, slope=float(negative_slope))
    out_planes = pl.pallas_call(
        kernel2,
        out_shape=jax.ShapeDtypeStruct((B, D, Cout, hwq), x.dtype),
        grid_spec=pltpu.PrefetchScalarGridSpec(
            num_scalar_prefetch=0,
            grid=(B, D // td),
            in_specs=[
                pl.BlockSpec((1, Cout, 1), lambda b, t: (b, 0, 0)),
                pl.BlockSpec((1, Cout, 1), lambda b, t: (b, 0, 0)),
                pl.BlockSpec((1, td, Cout, hwq), lambda b, t: (b, t, 0, 0)),
            ],
            out_specs=pl.BlockSpec((1, td, Cout, hwq), lambda b, t: (b, t, 0, 0)),
        ),
        compiler_params=pltpu.CompilerParams(
            dimension_semantics=("parallel", "parallel"),
            vmem_limit_bytes=vmem_limit,
        ),
    )(scale, shift, y_pre)

    # --- un-flatten, drop padded rows/cols, return NCDHW.
    out = out_planes[:, :, :, :hwp].reshape(B, D, Cout, Hp, Wp)
    out = jnp.transpose(out, (0, 2, 1, 3, 4))[:, :, :, :H, :W]
    return out


def _conv_block_reference(x, weight, bias, gamma, beta, *,
                          eps=1e-5, negative_slope=0.01):
    """Pure-JAX reference matching the PyTorch ConvBlock forward (f32)."""
    y = jax.lax.conv_general_dilated(
        x.astype(jnp.float32), weight.astype(jnp.float32),
        window_strides=(1, 1, 1),
        padding=((1, 1), (1, 1), (1, 1)),
        dimension_numbers=("NCDHW", "OIDHW", "NCDHW"),
        precision=jax.lax.Precision.HIGHEST)
    y = y + bias[None, :, None, None, None]
    mean = jnp.mean(y, axis=(2, 3, 4), keepdims=True)
    var = jnp.mean((y - mean) ** 2, axis=(2, 3, 4), keepdims=True)  # biased
    y = (y - mean) * jax.lax.rsqrt(var + eps)
    y = y * gamma[None, :, None, None, None] + beta[None, :, None, None, None]
    return jnp.where(y >= 0, y, negative_slope * y)


if __name__ == "__main__":
    # Small shapes consistent with the module: (batch, channels, D, H, W).
    B, Cin, Cout, D, H, W = 2, 4, 8, 8, 8, 8
    key = jax.random.PRNGKey(0)
    kx, kw, kb, kg, kbeta = jax.random.split(key, 5)
    x = jax.random.normal(kx, (B, Cin, D, H, W), dtype=jnp.float32)
    weight = 0.1 * jax.random.normal(kw, (Cout, Cin, 3, 3, 3), dtype=jnp.float32)
    bias = 0.1 * jax.random.normal(kb, (Cout,), dtype=jnp.float32)
    gamma = 1.0 + 0.1 * jax.random.normal(kg, (Cout,), dtype=jnp.float32)
    beta = 0.1 * jax.random.normal(kbeta, (Cout,), dtype=jnp.float32)

    fwd = jax.jit(conv_block_forward)
    out = jax.block_until_ready(fwd(x, weight, bias, gamma, beta))

    ref = _conv_block_reference(x, weight, bias, gamma, beta)
    assert out.shape == (B, Cout, D, H, W)
    err = float(jnp.max(jnp.abs(out - ref)))
    # bf16 conv operands with f32 accumulation: expected max error ~1e-2.
    assert err < 3e-2, f"max abs error {err}"
    print("KERNEL_OK")
</pallas_src>

<mosaic_0001>
module attributes {stable_mosaic.version = 11 : i64} {
  func.func @_conv_stats_kernel(%arg0: i32, %arg1: i32, %arg2: memref<1x128xf32, #tpu.memory_space<vmem>>, %arg3: memref<8x108xbf16, #tpu.memory_space<vmem>>, %arg4: memref<8x1xf32, #tpu.memory_space<vmem>>, %arg5: memref<1x1x4x150xbf16, #tpu.memory_space<vmem>>, %arg6: memref<1x1x4x150xbf16, #tpu.memory_space<vmem>>, %arg7: memref<1x1x4x150xbf16, #tpu.memory_space<vmem>>, %arg8: memref<1x1x8x128xf32, #tpu.memory_space<vmem>>, %arg9: memref<1x1x8x2xf32, #tpu.memory_space<vmem>>, %arg10: memref<108x128xbf16, #tpu.memory_space<vmem>>) attributes {dimension_semantics = [#tpu.dimension_semantics<parallel>, #tpu.dimension_semantics<parallel>], iteration_bounds = array<i64: 2, 8>, scalar_prefetch = 0 : i64, scratch_operands = 1 : i64, tpu.core_type = #tpu.core_type<tc>, window_params = [{pipeline_mode = #tpu.pipeline_mode<synchronous>, transform_indices = @transform_0, window_bounds = array<i64: 1, 128>}, {pipeline_mode = #tpu.pipeline_mode<synchronous>, transform_indices = @transform_1, window_bounds = array<i64: 8, 108>}, {pipeline_mode = #tpu.pipeline_mode<synchronous>, transform_indices = @transform_2, window_bounds = array<i64: 8, 1>}, {transform_indices = @transform_3, window_bounds = array<i64: 1, 1, 4, 150>}, {transform_indices = @transform_4, window_bounds = array<i64: 1, 1, 4, 150>}, {transform_indices = @transform_5, window_bounds = array<i64: 1, 1, 4, 150>}, {transform_indices = @transform_6, window_bounds = array<i64: 1, 1, 8, 128>}, {transform_indices = @transform_7, window_bounds = array<i64: 1, 1, 8, 2>}]} {
    %c0 = arith.constant 0 : index
    %c0_0 = arith.constant 0 : index
    %c0_1 = arith.constant 0 : index
    %c0_2 = arith.constant 0 : index
    %0 = vector.load %arg5[%c0, %c0_0, %c0_1, %c0_2] : memref<1x1x4x150xbf16, #tpu.memory_space<vmem>>, vector<1x1x4x128xbf16>
    %1 = vector.shape_cast %0 : vector<1x1x4x128xbf16> to vector<4x128xbf16>
    %c0_3 = arith.constant 0 : index
    %c0_4 = arith.constant 0 : index
    %2 = vector.load %arg10[%c0_3, %c0_4] : memref<108x128xbf16, #tpu.memory_space<vmem>>, vector<4x128xbf16>
    tpu.vector_store %arg10[%c0_3, %c0_4], %1 {strides = array<i32>} : memref<108x128xbf16, #tpu.memory_space<vmem>>, vector<4x128xbf16>,
    %c0_5 = arith.constant 0 : index
    %c0_6 = arith.constant 0 : index
    %c0_7 = arith.constant 0 : index
    %c1 = arith.constant 1 : index
    %3 = vector.load %arg5[%c0_5, %c0_6, %c0_7, %c1] : memref<1x1x4x150xbf16, #tpu.memory_space<vmem>>, vector<1x1x4x128xbf16>
    %4 = vector.shape_cast %3 : vector<1x1x4x128xbf16> to vector<4x128xbf16>
    %c4 = arith.constant 4 : index
    %c0_8 = arith.constant 0 : index
    %5 = vector.load %arg10[%c4, %c0_8] : memref<108x128xbf16, #tpu.memory_space<vmem>>, vector<4x128xbf16>
    tpu.vector_store %arg10[%c4, %c0_8], %4 {strides = array<i32>} : memref<108x128xbf16, #tpu.memory_space<vmem>>, vector<4x128xbf16>,
    %c0_9 = arith.constant 0 : index
    %c0_10 = arith.constant 0 : index
    %c0_11 = arith.constant 0 : index
    %c2 = arith.constant 2 : index
    %6 = vector.load %arg5[%c0_9, %c0_10, %c0_11, %c2] : memref<1x1x4x150xbf16, #tpu.memory_space<vmem>>, vector<1x1x4x128xbf16>
    %7 = vector.shape_cast %6 : vector<1x1x4x128xbf16> to vector<4x128xbf16>
    %c8 = arith.constant 8 : index
    %c0_12 = arith.constant 0 : index
    %8 = vector.load %arg10[%c8, %c0_12] : memref<108x128xbf16, #tpu.memory_space<vmem>>, vector<4x128xbf16>
    tpu.vector_store %arg10[%c8, %c0_12], %7 {strides = array<i32>} : memref<108x128xbf16, #tpu.memory_space<vmem>>, vector<4x128xbf16>,
    %c0_13 = arith.constant 0 : index
    %c0_14 = arith.constant 0 : index
    %c0_15 = arith.constant 0 : index
    %c10 = arith.constant 10 : index
    %9 = vector.load %arg5[%c0_13, %c0_14, %c0_15, %c10] : memref<1x1x4x150xbf16, #tpu.memory_space<vmem>>, vector<1x1x4x128xbf16>
    %10 = vector.shape_cast %9 : vector<1x1x4x128xbf16> to vector<4x128xbf16>
    %c12 = arith.constant 12 : index
    %c0_16 = arith.constant 0 : index
    %11 = vector.load %arg10[%c12, %c0_16] : memref<108x128xbf16, #tpu.memory_space<vmem>>, vector<4x128xbf16>
    tpu.vector_store %arg10[%c12, %c0_16], %10 {strides = array<i32>} : memref<108x128xbf16, #tpu.memory_space<vmem>>, vector<4x128xbf16>,
    %c0_17 = arith.constant 0 : index
    %c0_18 = arith.constant 0 : index
    %c0_19 = arith.constant 0 : index
    %c11 = arith.constant 11 : index
    %12 = vector.load %arg5[%c0_17, %c0_18, %c0_19, %c11] : memref<1x1x4x150xbf16, #tpu.memory_space<vmem>>, vector<1x1x4x128xbf16>
    %13 = vector.shape_cast %12 : vector<1x1x4x128xbf16> to vector<4x128xbf16>
    %c16 = arith.constant 16 : index
    %c0_20 = arith.constant 0 : index
    %14 = vector.load %arg10[%c16, %c0_20] : memref<108x128xbf16, #tpu.memory_space<vmem>>, vector<4x128xbf16>
    tpu.vector_store %arg10[%c16, %c0_20], %13 {strides = array<i32>} : memref<108x128xbf16, #tpu.memory_space<vmem>>, vector<4x128xbf16>,
    %c0_21 = arith.constant 0 : index
    %c0_22 = arith.constant 0 : index
    %c0_23 = arith.constant 0 : index
    %c12_24 = arith.constant 12 : index
    %15 = vector.load %arg5[%c0_21, %c0_22, %c0_23, %c12_24] : memref<1x1x4x150xbf16, #tpu.memory_space<vmem>>, vector<1x1x4x128xbf16>
    %16 = vector.shape_cast %15 : vector<1x1x4x128xbf16> to vector<4x128xbf16>
    %c20 = arith.constant 20 : index
    %c0_25 = arith.constant 0 : index
    %17 = vector.load %arg10[%c20, %c0_25] : memref<108x128xbf16, #tpu.memory_space<vmem>>, vector<4x128xbf16>
    tpu.vector_store %arg10[%c20, %c0_25], %16 {strides = array<i32>} : memref<108x128xbf16, #tpu.memory_space<vmem>>, vector<4x128xbf16>,
    %c0_26 = arith.constant 0 : index
    %c0_27 = arith.constant 0 : index
    %c0_28 = arith.constant 0 : index
    %c20_29 = arith.constant 20 : index
    %18 = vector.load %arg5[%c0_26, %c0_27, %c0_28, %c20_29] : memref<1x1x4x150xbf16, #tpu.memory_space<vmem>>, vector<1x1x4x128xbf16>
    %19 = vector.shape_cast %18 : vector<1x1x4x128xbf16> to vector<4x128xbf16>
    %c24 = arith.constant 24 : index
    %c0_30 = arith.constant 0 : index
    %20 = vector.load %arg10[%c24, %c0_30] : memref<108x128xbf16, #tpu.memory_space<vmem>>, vector<4x128xbf16>
    tpu.vector_store %arg10[%c24, %c0_30], %19 {strides = array<i32>} : memref<108x128xbf16, #tpu.memory_space<vmem>>, vector<4x128xbf16>,
    %c0_31 = arith.constant 0 : index
    %c0_32 = arith.constant 0 : index
    %c0_33 = arith.constant 0 : index
    %c21 = arith.constant 21 : index
    %21 = vector.load %arg5[%c0_31, %c0_32, %c0_33, %c21] : memref<1x1x4x150xbf16, #tpu.memory_space<vmem>>, vector<1x1x4x128xbf16>
    %22 = vector.shape_cast %21 : vector<1x1x4x128xbf16> to vector<4x128xbf16>
    %c28 = arith.constant 28 : index
    %c0_34 = arith.constant 0 : index
    %23 = vector.load %arg10[%c28, %c0_34] : memref<108x128xbf16, #tpu.memory_space<vmem>>, vector<4x128xbf16>
    tpu.vector_store %arg10[%c28, %c0_34], %22 {strides = array<i32>} : memref<108x128xbf16, #tpu.memory_space<vmem>>, vector<4x128xbf16>,
    %c0_35 = arith.constant 0 : index
    %c0_36 = arith.constant 0 : index
    %c0_37 = arith.constant 0 : index
    %c22 = arith.constant 22 : index
    %24 = vector.load %arg5[%c0_35, %c0_36, %c0_37, %c22] : memref<1x1x4x150xbf16, #tpu.memory_space<vmem>>, vector<1x1x4x128xbf16>
    %25 = vector.shape_cast %24 : vector<1x1x4x128xbf16> to vector<4x128xbf16>
    %c32 = arith.constant 32 : index
    %c0_38 = arith.constant 0 : index
    %26 = vector.load %arg10[%c32, %c0_38] : memref<108x128xbf16, #tpu.memory_space<vmem>>, vector<4x128xbf16>
    tpu.vector_store %arg10[%c32, %c0_38], %25 {strides = array<i32>} : memref<108x128xbf16, #tpu.memory_space<vmem>>, vector<4x128xbf16>,
    %c0_39 = arith.constant 0 : index
    %c0_40 = arith.constant 0 : index
    %c0_41 = arith.constant 0 : index
    %c0_42 = arith.constant 0 : index
    %27 = vector.load %arg6[%c0_39, %c0_40, %c0_41, %c0_42] : memref<1x1x4x150xbf16, #tpu.memory_space<vmem>>, vector<1x1x4x128xbf16>
    %28 = vector.shape_cast %27 : vector<1x1x4x128xbf16> to vector<4x128xbf16>
    %c36 = arith.constant 36 : index
    %c0_43 = arith.constant 0 : index
    %29 = vector.load %arg10[%c36, %c0_43] : memref<108x128xbf16, #tpu.memory_space<vmem>>, vector<4x128xbf16>
    tpu.vector_store %arg10[%c36, %c0_43], %28 {strides = array<i32>} : memref<108x128xbf16, #tpu.memory_space<vmem>>, vector<4x128xbf16>,
    %c0_44 = arith.constant 0 : index
    %c0_45 = arith.constant 0 : index
    %c0_46 = arith.constant 0 : index
    %c1_47 = arith.constant 1 : index
    %30 = vector.load %arg6[%c0_44, %c0_45, %c0_46, %c1_47] : memref<1x1x4x150xbf16, #tpu.memory_space<vmem>>, vector<1x1x4x128xbf16>
    %31 = vector.shape_cast %30 : vector<1x1x4x128xbf16> to vector<4x128xbf16>
    %c40 = arith.constant 40 : index
    %c0_48 = arith.constant 0 : index
    %32 = vector.load %arg10[%c40, %c0_48] : memref<108x128xbf16, #tpu.memory_space<vmem>>, vector<4x128xbf16>
    tpu.vector_store %arg10[%c40, %c0_48], %31 {strides = array<i32>} : memref<108x128xbf16, #tpu.memory_space<vmem>>, vector<4x128xbf16>,
    %c0_49 = arith.constant 0 : index
    %c0_50 = arith.constant 0 : index
    %c0_51 = arith.constant 0 : index
    %c2_52 = arith.constant 2 : index
    %33 = vector.load %arg6[%c0_49, %c0_50, %c0_51, %c2_52] : memref<1x1x4x150xbf16, #tpu.memory_space<vmem>>, vector<1x1x4x128xbf16>
    %34 = vector.shape_cast %33 : vector<1x1x4x128xbf16> to vector<4x128xbf16>
    %c44 = arith.constant 44 : index
    %c0_53 = arith.constant 0 : index
    %35 = vector.load %arg10[%c44, %c0_53] : memref<108x128xbf16, #tpu.memory_space<vmem>>, vector<4x128xbf16>
    tpu.vector_store %arg10[%c44, %c0_53], %34 {strides = array<i32>} : memref<108x128xbf16, #tpu.memory_space<vmem>>, vector<4x128xbf16>,
    %c0_54 = arith.constant 0 : index
    %c0_55 = arith.constant 0 : index
    %c0_56 = arith.constant 0 : index
    %c10_57 = arith.constant 10 : index
    %36 = vector.load %arg6[%c0_54, %c0_55, %c0_56, %c10_57] : memref<1x1x4x150xbf16, #tpu.memory_space<vmem>>, vector<1x1x4x128xbf16>
    %37 = vector.shape_cast %36 : vector<1x1x4x128xbf16> to vector<4x128xbf16>
    %c48 = arith.constant 48 : index
    %c0_58 = arith.constant 0 : index
    %38 = vector.load %arg10[%c48, %c0_58] : memref<108x128xbf16, #tpu.memory_space<vmem>>, vector<4x128xbf16>
    tpu.vector_store %arg10[%c48, %c0_58], %37 {strides = array<i32>} : memref<108x128xbf16, #tpu.memory_space<vmem>>, vector<4x128xbf16>,
    %c0_59 = arith.constant 0 : index
    %c0_60 = arith.constant 0 : index
    %c0_61 = arith.constant 0 : index
    %c11_62 = arith.constant 11 : index
    %39 = vector.load %arg6[%c0_59, %c0_60, %c0_61, %c11_62] : memref<1x1x4x150xbf16, #tpu.memory_space<vmem>>, vector<1x1x4x128xbf16>
    %40 = vector.shape_cast %39 : vector<1x1x4x128xbf16> to vector<4x128xbf16>
    %c52 = arith.constant 52 : index
    %c0_63 = arith.constant 0 : index
    %41 = vector.load %arg10[%c52, %c0_63] : memref<108x128xbf16, #tpu.memory_space<vmem>>, vector<4x128xbf16>
    tpu.vector_store %arg10[%c52, %c0_63], %40 {strides = array<i32>} : memref<108x128xbf16, #tpu.memory_space<vmem>>, vector<4x128xbf16>,
    %c0_64 = arith.constant 0 : index
    %c0_65 = arith.constant 0 : index
    %c0_66 = arith.constant 0 : index
    %c12_67 = arith.constant 12 : index
    %42 = vector.load %arg6[%c0_64, %c0_65, %c0_66, %c12_67] : memref<1x1x4x150xbf16, #tpu.memory_space<vmem>>, vector<1x1x4x128xbf16>
    %43 = vector.shape_cast %42 : vector<1x1x4x128xbf16> to vector<4x128xbf16>
    %c56 = arith.constant 56 : index
    %c0_68 = arith.constant 0 : index
    %44 = vector.load %arg10[%c56, %c0_68] : memref<108x128xbf16, #tpu.memory_space<vmem>>, vector<4x128xbf16>
    tpu.vector_store %arg10[%c56, %c0_68], %43 {strides = array<i32>} : memref<108x128xbf16, #tpu.memory_space<vmem>>, vector<4x128xbf16>,
    %c0_69 = arith.constant 0 : index
    %c0_70 = arith.constant 0 : index
    %c0_71 = arith.constant 0 : index
    %c20_72 = arith.constant 20 : index
    %45 = vector.load %arg6[%c0_69, %c0_70, %c0_71, %c20_72] : memref<1x1x4x150xbf16, #tpu.memory_space<vmem>>, vector<1x1x4x128xbf16>
    %46 = vector.shape_cast %45 : vector<1x1x4x128xbf16> to vector<4x128xbf16>
    %c60 = arith.constant 60 : index
    %c0_73 = arith.constant 0 : index
    %47 = vector.load %arg10[%c60, %c0_73] : memref<108x128xbf16, #tpu.memory_space<vmem>>, vector<4x128xbf16>
    tpu.vector_store %arg10[%c60, %c0_73], %46 {strides = array<i32>} : memref<108x128xbf16, #tpu.memory_space<vmem>>, vector<4x128xbf16>,
    %c0_74 = arith.constant 0 : index
    %c0_75 = arith.constant 0 : index
    %c0_76 = arith.constant 0 : index
    %c21_77 = arith.constant 21 : index
    %48 = vector.load %arg6[%c0_74, %c0_75, %c0_76, %c21_77] : memref<1x1x4x150xbf16, #tpu.memory_space<vmem>>, vector<1x1x4x128xbf16>
    %49 = vector.shape_cast %48 : vector<1x1x4x128xbf16> to vector<4x128xbf16>
    %c64 = arith.constant 64 : index
    %c0_78 = arith.constant 0 : index
    %50 = vector.load %arg10[%c64, %c0_78] : memref<108x128xbf16, #tpu.memory_space<vmem>>, vector<4x128xbf16>
    tpu.vector_store %arg10[%c64, %c0_78], %49 {strides = array<i32>} : memref<108x128xbf16, #tpu.memory_space<vmem>>, vector<4x128xbf16>,
    %c0_79 = arith.constant 0 : index
    %c0_80 = arith.constant 0 : index
    %c0_81 = arith.constant 0 : index
    %c22_82 = arith.constant 22 : index
    %51 = vector.load %arg6[%c0_79, %c0_80, %c0_81, %c22_82] : memref<1x1x4x150xbf16, #tpu.memory_space<vmem>>, vector<1x1x4x128xbf16>
    %52 = vector.shape_cast %51 : vector<1x1x4x128xbf16> to vector<4x128xbf16>
    %c68 = arith.constant 68 : index
    %c0_83 = arith.constant 0 : index
    %53 = vector.load %arg10[%c68, %c0_83] : memref<108x128xbf16, #tpu.memory_space<vmem>>, vector<4x128xbf16>
    tpu.vector_store %arg10[%c68, %c0_83], %52 {strides = array<i32>} : memref<108x128xbf16, #tpu.memory_space<vmem>>, vector<4x128xbf16>,
    %c0_84 = arith.constant 0 : index
    %c0_85 = arith.constant 0 : index
    %c0_86 = arith.constant 0 : index
    %c0_87 = arith.constant 0 : index
    %54 = vector.load %arg7[%c0_84, %c0_85, %c0_86, %c0_87] : memref<1x1x4x150xbf16, #tpu.memory_space<vmem>>, vector<1x1x4x128xbf16>
    %55 = vector.shape_cast %54 : vector<1x1x4x128xbf16> to vector<4x128xbf16>
    %c72 = arith.constant 72 : index
    %c0_88 = arith.constant 0 : index
    %56 = vector.load %arg10[%c72, %c0_88] : memref<108x128xbf16, #tpu.memory_space<vmem>>, vector<4x128xbf16>
    tpu.vector_store %arg10[%c72, %c0_88], %55 {strides = array<i32>} : memref<108x128xbf16, #tpu.memory_space<vmem>>, vector<4x128xbf16>,
    %c0_89 = arith.constant 0 : index
    %c0_90 = arith.constant 0 : index
    %c0_91 = arith.constant 0 : index
    %c1_92 = arith.constant 1 : index
    %57 = vector.load %arg7[%c0_89, %c0_90, %c0_91, %c1_92] : memref<1x1x4x150xbf16, #tpu.memory_space<vmem>>, vector<1x1x4x128xbf16>
    %58 = vector.shape_cast %57 : vector<1x1x4x128xbf16> to vector<4x128xbf16>
    %c76 = arith.constant 76 : index
    %c0_93 = arith.constant 0 : index
    %59 = vector.load %arg10[%c76, %c0_93] : memref<108x128xbf16, #tpu.memory_space<vmem>>, vector<4x128xbf16>
    tpu.vector_store %arg10[%c76, %c0_93], %58 {strides = array<i32>} : memref<108x128xbf16, #tpu.memory_space<vmem>>, vector<4x128xbf16>,
    %c0_94 = arith.constant 0 : index
    %c0_95 = arith.constant 0 : index
    %c0_96 = arith.constant 0 : index
    %c2_97 = arith.constant 2 : index
    %60 = vector.load %arg7[%c0_94, %c0_95, %c0_96, %c2_97] : memref<1x1x4x150xbf16, #tpu.memory_space<vmem>>, vector<1x1x4x128xbf16>
    %61 = vector.shape_cast %60 : vector<1x1x4x128xbf16> to vector<4x128xbf16>
    %c80 = arith.constant 80 : index
    %c0_98 = arith.constant 0 : index
    %62 = vector.load %arg10[%c80, %c0_98] : memref<108x128xbf16, #tpu.memory_space<vmem>>, vector<4x128xbf16>
    tpu.vector_store %arg10[%c80, %c0_98], %61 {strides = array<i32>} : memref<108x128xbf16, #tpu.memory_space<vmem>>, vector<4x128xbf16>,
    %c0_99 = arith.constant 0 : index
    %c0_100 = arith.constant 0 : index
    %c0_101 = arith.constant 0 : index
    %c10_102 = arith.constant 10 : index
    %63 = vector.load %arg7[%c0_99, %c0_100, %c0_101, %c10_102] : memref<1x1x4x150xbf16, #tpu.memory_space<vmem>>, vector<1x1x4x128xbf16>
    %64 = vector.shape_cast %63 : vector<1x1x4x128xbf16> to vector<4x128xbf16>
    %c84 = arith.constant 84 : index
    %c0_103 = arith.constant 0 : index
    %65 = vector.load %arg10[%c84, %c0_103] : memref<108x128xbf16, #tpu.memory_space<vmem>>, vector<4x128xbf16>
    tpu.vector_store %arg10[%c84, %c0_103], %64 {strides = array<i32>} : memref<108x128xbf16, #tpu.memory_space<vmem>>, vector<4x128xbf16>,
    %c0_104 = arith.constant 0 : index
    %c0_105 = arith.constant 0 : index
    %c0_106 = arith.constant 0 : index
    %c11_107 = arith.constant 11 : index
    %66 = vector.load %arg7[%c0_104, %c0_105, %c0_106, %c11_107] : memref<1x1x4x150xbf16, #tpu.memory_space<vmem>>, vector<1x1x4x128xbf16>
    %67 = vector.shape_cast %66 : vector<1x1x4x128xbf16> to vector<4x128xbf16>
    %c88 = arith.constant 88 : index
    %c0_108 = arith.constant 0 : index
    %68 = vector.load %arg10[%c88, %c0_108] : memref<108x128xbf16, #tpu.memory_space<vmem>>, vector<4x128xbf16>
    tpu.vector_store %arg10[%c88, %c0_108], %67 {strides = array<i32>} : memref<108x128xbf16, #tpu.memory_space<vmem>>, vector<4x128xbf16>,
    %c0_109 = arith.constant 0 : index
    %c0_110 = arith.constant 0 : index
    %c0_111 = arith.constant 0 : index
    %c12_112 = arith.constant 12 : index
    %69 = vector.load %arg7[%c0_109, %c0_110, %c0_111, %c12_112] : memref<1x1x4x150xbf16, #tpu.memory_space<vmem>>, vector<1x1x4x128xbf16>
    %70 = vector.shape_cast %69 : vector<1x1x4x128xbf16> to vector<4x128xbf16>
    %c92 = arith.constant 92 : index
    %c0_113 = arith.constant 0 : index
    %71 = vector.load %arg10[%c92, %c0_113] : memref<108x128xbf16, #tpu.memory_space<vmem>>, vector<4x128xbf16>
    tpu.vector_store %arg10[%c92, %c0_113], %70 {strides = array<i32>} : memref<108x128xbf16, #tpu.memory_space<vmem>>, vector<4x128xbf16>,
    %c0_114 = arith.constant 0 : index
    %c0_115 = arith.constant 0 : index
    %c0_116 = arith.constant 0 : index
    %c20_117 = arith.constant 20 : index
    %72 = vector.load %arg7[%c0_114, %c0_115, %c0_116, %c20_117] : memref<1x1x4x150xbf16, #tpu.memory_space<vmem>>, vector<1x1x4x128xbf16>
    %73 = vector.shape_cast %72 : vector<1x1x4x128xbf16> to vector<4x128xbf16>
    %c96 = arith.constant 96 : index
    %c0_118 = arith.constant 0 : index
    %74 = vector.load %arg10[%c96, %c0_118] : memref<108x128xbf16, #tpu.memory_space<vmem>>, vector<4x128xbf16>
    tpu.vector_store %arg10[%c96, %c0_118], %73 {strides = array<i32>} : memref<108x128xbf16, #tpu.memory_space<vmem>>, vector<4x128xbf16>,
    %c0_119 = arith.constant 0 : index
    %c0_120 = arith.constant 0 : index
    %c0_121 = arith.constant 0 : index
    %c21_122 = arith.constant 21 : index
    %75 = vector.load %arg7[%c0_119, %c0_120, %c0_121, %c21_122] : memref<1x1x4x150xbf16, #tpu.memory_space<vmem>>, vector<1x1x4x128xbf16>
    %76 = vector.shape_cast %75 : vector<1x1x4x128xbf16> to vector<4x128xbf16>
    %c100 = arith.constant 100 : index
    %c0_123 = arith.constant 0 : index
    %77 = vector.load %arg10[%c100, %c0_123] : memref<108x128xbf16, #tpu.memory_space<vmem>>, vector<4x128xbf16>
    tpu.vector_store %arg10[%c100, %c0_123], %76 {strides = array<i32>} : memref<108x128xbf16, #tpu.memory_space<vmem>>, vector<4x128xbf16>,
    %c0_124 = arith.constant 0 : index
    %c0_125 = arith.constant 0 : index
    %c0_126 = arith.constant 0 : index
    %c22_127 = arith.constant 22 : index
    %78 = vector.load %arg7[%c0_124, %c0_125, %c0_126, %c22_127] : memref<1x1x4x150xbf16, #tpu.memory_space<vmem>>, vector<1x1x4x128xbf16>
    %79 = vector.shape_cast %78 : vector<1x1x4x128xbf16> to vector<4x128xbf16>
    %c104 = arith.constant 104 : index
    %c0_128 = arith.constant 0 : index
    %80 = vector.load %arg10[%c104, %c0_128] : memref<108x128xbf16, #tpu.memory_space<vmem>>, vector<4x128xbf16>
    tpu.vector_store %arg10[%c104, %c0_128], %79 {strides = array<i32>} : memref<108x128xbf16, #tpu.memory_space<vmem>>, vector<4x128xbf16>,
    %c0_129 = arith.constant 0 : index
    %c0_130 = arith.constant 0 : index
    %81 = vector.load %arg3[%c0_129, %c0_130] : memref<8x108xbf16, #tpu.memory_space<vmem>>, vector<8x108xbf16>
    %c0_131 = arith.constant 0 : index
    %c0_132 = arith.constant 0 : index
    %82 = vector.load %arg10[%c0_131, %c0_132] : memref<108x128xbf16, #tpu.memory_space<vmem>>, vector<108x128xbf16>
    %cst = arith.constant dense<0.000000e+00> : vector<8x128xf32>
    %83 = tpu.matmul %81, %82, %cst {dimension_numbers = #tpu.dot_dimension_numbers<[1], [0], [0], [1], [0, 0, 1, 1], [], []>} : vector<8x108xbf16>, vector<108x128xbf16>, vector<8x128xf32> -> vector<8x128xf32>
    %c0_133 = arith.constant 0 : index
    %c0_134 = arith.constant 0 : index
    %84 = vector.load %arg4[%c0_133, %c0_134] : memref<8x1xf32, #tpu.memory_space<vmem>>, vector<8x1xf32>
    %85 = vector.broadcast %84 : vector<8x1xf32> to vector<8x128xf32>
    %86 = arith.addf %83, %85 : vector<8x128xf32>
    %c0_135 = arith.constant 0 : index
    %c0_136 = arith.constant 0 : index
    %87 = vector.load %arg2[%c0_135, %c0_136] : memref<1x128xf32, #tpu.memory_space<vmem>>, vector<1x128xf32>
    %cst_137 = arith.constant 5.000000e-01 : f32
    %88 = vector.broadcast %cst_137 : f32 to vector<1x128xf32>
    %89 = arith.cmpf ogt, %87, %88 : vector<1x128xf32>
    %cst_138 = arith.constant 0.000000e+00 : f32
    %90 = vector.shape_cast %89 : vector<1x128xi1> to vector<1x128xi1>
    %91 = vector.broadcast %90 : vector<1x128xi1> to vector<8x128xi1>
    %92 = vector.broadcast %cst_138 : f32 to vector<8x128xf32>
    %93 = arith.select %91, %86, %92 : vector<8x128xi1>, vector<8x128xf32>
    %cst_139 = arith.constant dense<0.000000e+00> : vector<8xf32>
    %94 = vector.multi_reduction <add>, %93, %cst_139 [1] : vector<8x128xf32> to vector<8xf32>
    %95 = vector.shape_cast %94 : vector<8xf32> to vector<8x1xf32>
    %c0_140 = arith.constant 0 : index
    %c0_141 = arith.constant 0 : index
    %c0_142 = arith.constant 0 : index
    %c0_143 = arith.constant 0 : index
    %96 = vector.load %arg9[%c0_140, %c0_141, %c0_142, %c0_143] : memref<1x1x8x2xf32, #tpu.memory_space<vmem>>, vector<1x1x8x1xf32>
    %97 = vector.shape_cast %96 : vector<1x1x8x1xf32> to vector<8x1xf32>
    %98 = vector.shape_cast %95 : vector<8x1xf32> to vector<1x1x8x1xf32>
    tpu.vector_store %arg9[%c0_140, %c0_141, %c0_142, %c0_143], %98 {strides = array<i32>} : memref<1x1x8x2xf32, #tpu.memory_space<vmem>>, vector<1x1x8x1xf32>,
    %99 = arith.mulf %93, %86 : vector<8x128xf32>
    %cst_144 = arith.constant dense<0.000000e+00> : vector<8xf32>
    %100 = vector.multi_reduction <add>, %99, %cst_144 [1] : vector<8x128xf32> to vector<8xf32>
    %101 = vector.shape_cast %100 : vector<8xf32> to vector<8x1xf32>
    %c0_145 = arith.constant 0 : index
    %c0_146 = arith.constant 0 : index
    %c0_147 = arith.constant 0 : index
    %c1_148 = arith.constant 1 : index
    %102 = vector.load %arg9[%c0_145, %c0_146, %c0_147, %c1_148] : memref<1x1x8x2xf32, #tpu.memory_space<vmem>>, vector<1x1x8x1xf32>
    %103 = vector.shape_cast %102 : vector<1x1x8x1xf32> to vector<8x1xf32>
    %104 = vector.shape_cast %101 : vector<8x1xf32> to vector<1x1x8x1xf32>
    tpu.vector_store %arg9[%c0_145, %c0_146, %c0_147, %c1_148], %104 {strides = array<i32>} : memref<1x1x8x2xf32, #tpu.memory_space<vmem>>, vector<1x1x8x1xf32>,
    %c0_149 = arith.constant 0 : index
    %c0_150 = arith.constant 0 : index
    %c0_151 = arith.constant 0 : index
    %c0_152 = arith.constant 0 : index
    %105 = vector.load %arg8[%c0_149, %c0_150, %c0_151, %c0_152] : memref<1x1x8x128xf32, #tpu.memory_space<vmem>>, vector<1x1x8x128xf32>
    %106 = vector.shape_cast %105 : vector<1x1x8x128xf32> to vector<8x128xf32>
    %107 = vector.shape_cast %86 : vector<8x128xf32> to vector<1x1x8x128xf32>
    tpu.vector_store %arg8[%c0_149, %c0_150, %c0_151, %c0_152], %107 {strides = array<i32>} : memref<1x1x8x128xf32, #tpu.memory_space<vmem>>, vector<1x1x8x128xf32>,
    return
  }
  func.func @transform_0(%arg0: i32, %arg1: i32) -> (i32, i32) {
    %c0_i32 = arith.constant 0 : i32
    %c0_i32_0 = arith.constant 0 : i32
    %c0_i32_1 = arith.constant 0 : i32
    return %c0_i32, %c0_i32_0 : i32, i32
  }
  func.func @transform_1(%arg0: i32, %arg1: i32) -> (i32, i32) {
    %c0_i32 = arith.constant 0 : i32
    %c0_i32_0 = arith.constant 0 : i32
    %c0_i32_1 = arith.constant 0 : i32
    return %c0_i32, %c0_i32_0 : i32, i32
  }
  func.func @transform_2(%arg0: i32, %arg1: i32) -> (i32, i32) {
    %c0_i32 = arith.constant 0 : i32
    %c0_i32_0 = arith.constant 0 : i32
    %c0_i32_1 = arith.constant 0 : i32
    return %c0_i32, %c0_i32_0 : i32, i32
  }
  func.func @transform_3(%arg0: i32, %arg1: i32) -> (i32, i32, i32, i32) {
    %c0_i32 = arith.constant 0 : i32
    %c0_i32_0 = arith.constant 0 : i32
    %c0_i32_1 = arith.constant 0 : i32
    return %arg0, %arg1, %c0_i32, %c0_i32_0 : i32, i32, i32, i32
  }
  func.func @transform_4(%arg0: i32, %arg1: i32) -> (i32, i32, i32, i32) {
    %c1_i32 = arith.constant 1 : i32
    %0 = arith.addi %arg1, %c1_i32 : i32
    %c0_i32 = arith.constant 0 : i32
    %c0_i32_0 = arith.constant 0 : i32
    %c0_i32_1 = arith.constant 0 : i32
    return %arg0, %0, %c0_i32, %c0_i32_0 : i32, i32, i32, i32
  }
  func.func @transform_5(%arg0: i32, %arg1: i32) -> (i32, i32, i32, i32) {
    %c2_i32 = arith.constant 2 : i32
    %0 = arith.addi %arg1, %c2_i32 : i32
    %c0_i32 = arith.constant 0 : i32
    %c0_i32_0 = arith.constant 0 : i32
    %c0_i32_1 = arith.constant 0 : i32
    return %arg0, %0, %c0_i32, %c0_i32_0 : i32, i32, i32, i32
  }
  func.func @transform_6(%arg0: i32, %arg1: i32) -> (i32, i32, i32, i32) {
    %c0_i32 = arith.constant 0 : i32
    %c0_i32_0 = arith.constant 0 : i32
    %c0_i32_1 = arith.constant 0 : i32
    return %arg0, %arg1, %c0_i32, %c0_i32_0 : i32, i32, i32, i32
  }
  func.func @transform_7(%arg0: i32, %arg1: i32) -> (i32, i32, i32, i32) {
    %c0_i32 = arith.constant 0 : i32
    %c0_i32_0 = arith.constant 0 : i32
    %c0_i32_1 = arith.constant 0 : i32
    return %arg0, %arg1, %c0_i32, %c0_i32_0 : i32, i32, i32, i32
  }
}

module attributes {stable_mosaic.version = 11 : i64} {
  func.func @_norm_act_kernel(%arg0: i32, %arg1: i32, %arg2: memref<1x8x1xf32, #tpu.memory_space<vmem>>, %arg3: memref<1x8x1xf32, #tpu.memory_space<vmem>>, %arg4: memref<1x8x8x128xf32, #tpu.memory_space<vmem>>, %arg5: memref<1x8x8x128xf32, #tpu.memory_space<vmem>>) attributes {dimension_semantics = [#tpu.dimension_semantics<parallel>, #tpu.dimension_semantics<parallel>], iteration_bounds = array<i64: 2, 1>, scalar_prefetch = 0 : i64, scratch_operands = 0 : i64, tpu.core_type = #tpu.core_type<tc>, window_params = [{transform_indices = @transform_0, window_bounds = array<i64: 1, 8, 1>}, {transform_indices = @transform_1, window_bounds = array<i64: 1, 8, 1>}, {transform_indices = @transform_2, window_bounds = array<i64: 1, 8, 8, 128>}, {transform_indices = @transform_3, window_bounds = array<i64: 1, 8, 8, 128>}]} {
    %c0 = arith.constant 0 : index
    %c0_0 = arith.constant 0 : index
    %c0_1 = arith.constant 0 : index
    %c0_2 = arith.constant 0 : index
    %0 = vector.load %arg4[%c0, %c0_0, %c0_1, %c0_2] : memref<1x8x8x128xf32, #tpu.memory_space<vmem>>, vector<1x8x8x128xf32>
    %1 = vector.shape_cast %0 : vector<1x8x8x128xf32> to vector<8x8x128xf32>
    %c0_3 = arith.constant 0 : index
    %c0_4 = arith.constant 0 : index
    %c0_5 = arith.constant 0 : index
    %2 = vector.load %arg2[%c0_3, %c0_4, %c0_5] : memref<1x8x1xf32, #tpu.memory_space<vmem>>, vector<1x8x1xf32>
    %3 = vector.shape_cast %2 : vector<1x8x1xf32> to vector<8x1xf32>
    %4 = vector.shape_cast %3 : vector<8x1xf32> to vector<1x8x1xf32>
    %5 = vector.broadcast %4 : vector<1x8x1xf32> to vector<8x8x128xf32>
    %6 = arith.mulf %1, %5 : vector<8x8x128xf32>
    %c0_6 = arith.constant 0 : index
    %c0_7 = arith.constant 0 : index
    %c0_8 = arith.constant 0 : index
    %7 = vector.load %arg3[%c0_6, %c0_7, %c0_8] : memref<1x8x1xf32, #tpu.memory_space<vmem>>, vector<1x8x1xf32>
    %8 = vector.shape_cast %7 : vector<1x8x1xf32> to vector<8x1xf32>
    %9 = vector.shape_cast %8 : vector<8x1xf32> to vector<1x8x1xf32>
    %10 = vector.broadcast %9 : vector<1x8x1xf32> to vector<8x8x128xf32>
    %11 = arith.addf %6, %10 : vector<8x8x128xf32>
    %cst = arith.constant 0.000000e+00 : f32
    %12 = vector.broadcast %cst : f32 to vector<8x8x128xf32>
    %13 = arith.cmpf oge, %11, %12 : vector<8x8x128xf32>
    %cst_9 = arith.constant 0.00999999977 : f32
    %14 = vector.broadcast %cst_9 : f32 to vector<8x8x128xf32>
    %15 = arith.mulf %14, %11 : vector<8x8x128xf32>
    %16 = arith.select %13, %11, %15 : vector<8x8x128xi1>, vector<8x8x128xf32>
    %c0_10 = arith.constant 0 : index
    %c0_11 = arith.constant 0 : index
    %c0_12 = arith.constant 0 : index
    %c0_13 = arith.constant 0 : index
    %17 = vector.load %arg5[%c0_10, %c0_11, %c0_12, %c0_13] : memref<1x8x8x128xf32, #tpu.memory_space<vmem>>, vector<1x8x8x128xf32>
    %18 = vector.shape_cast %17 : vector<1x8x8x128xf32> to vector<8x8x128xf32>
    %19 = vector.shape_cast %16 : vector<8x8x128xf32> to vector<1x8x8x128xf32>
    tpu.vector_store %arg5[%c0_10, %c0_11, %c0_12, %c0_13], %19 {strides = array<i32>} : memref<1x8x8x128xf32, #tpu.memory_space<vmem>>, vector<1x8x8x128xf32>,
    return
  }
  func.func @transform_0(%arg0: i32, %arg1: i32) -> (i32, i32, i32) {
    %c0_i32 = arith.constant 0 : i32
    %c0_i32_0 = arith.constant 0 : i32
    %c0_i32_1 = arith.constant 0 : i32
    return %arg0, %c0_i32, %c0_i32_0 : i32, i32, i32
  }
  func.func @transform_1(%arg0: i32, %arg1: i32) -> (i32, i32, i32) {
    %c0_i32 = arith.constant 0 : i32
    %c0_i32_0 = arith.constant 0 : i32
    %c0_i32_1 = arith.constant 0 : i32
    return %arg0, %c0_i32, %c0_i32_0 : i32, i32, i32
  }
  func.func @transform_2(%arg0: i32, %arg1: i32) -> (i32, i32, i32, i32) {
    %c0_i32 = arith.constant 0 : i32
    %c0_i32_0 = arith.constant 0 : i32
    %c0_i32_1 = arith.constant 0 : i32
    return %arg0, %arg1, %c0_i32, %c0_i32_0 : i32, i32, i32, i32
  }
  func.func @transform_3(%arg0: i32, %arg1: i32) -> (i32, i32, i32, i32) {
    %c0_i32 = arith.constant 0 : i32
    %c0_i32_0 = arith.constant 0 : i32
    %c0_i32_1 = arith.constant 0 : i32
    return %arg0, %arg1, %c0_i32, %c0_i32_0 : i32, i32, i32, i32
  }
}

</mosaic_0001>

<bundles_post_ra>
// kernel: conv_block_forward.3
= control target key start
LH: loop header
LB: loop body
LE: loop exit
PB: predicated region body
PF: predicated region fallthrough
CT: control target
= control target key end

     0   :  { %s509_s12 = smov 0   ;;  %s511_s13 = smov 0   ;;  %s559_s0 = inlined_call_operand.vmem [shape: f32[2,8,1], index: 0, kind: input, shape index: {}]   ;;  %s560_s1 = inlined_call_operand.vmem [shape: f32[2,8,1], index: 1, kind: input, shape index: {}]   ;;  %s561_s2 = inlined_call_operand.vmem [shape: f32[2,8,8,128], index: 2, kind: input, shape index: {}]   ;;  %s562_s3 = inlined_call_operand.vmem [shape: f32[2,8,8,128], index: 3, kind: output, shape index: {}]  }
   0x1   :  { %s513_s14 = smov 0  }
   0x2 LB: > { %s25_s15 = sadd.s32 1, %s482_s13  ;;  %p427_p0 = scmp.ge.s32.totalorder %s486_s14, 1  ;;  %s486_s14 = sphi %s513_s14, %s13_s14   ;;  %s482_s13 = sphi %s511_s13, %s564_s13   ;;  %s478_s12 = sphi %s509_s12, %s563_s12  }
   0x3   : > { %p27_p1 = scmp.ge.s32.totalorder %s25_s15, 2  ;;  %p176_p2 = scmp.lt.s32.totalorder %s486_s14, 3 }
   0x5   : > { %s566_s15 = smov (%p27_p1, %s25_s15), 0  ;;  %p177_p3 = pnand %p427_p0, %p176_p2 }
   0x6   : > { %p216_p4 = scmp.lt.s32.totalorder (!%p177_p3), %s478_s12, 1 }
   0x7   : > { %180 = sbr.rel (%p177_p3) target bundleno = 153 (0x99), region = 32 }
   0xc   : > { %v488_v0 = vmov 0   ;;  %s568_s12 = smov (!%p216_p4, %s478_s12), 1 }
   0xd   : > { %463 = vset.pattern.permute.xlu0 %v488_v0  ;;  %s428_s16 = sshll.u32 %s568_s12, 3  ;;  %s436_s23 = sshll.u32 %s568_s12, 6 }
   0xe   : > { %s219_s19 = scalar_lea.vmem %s559_s0, %s428_s16  ;;  %s223_s22 = scalar_lea.vmem %s560_s1, %s428_s16 }
   0xf   : > { %v252_v1 = vld [vmem:[%s219_s19] sm:$0xff]  ;;  %s232_s26 = scalar_lea.vmem %s561_s2, %s436_s23  ;;  %s242_s29 = scalar_lea.vmem %s562_s3, %s436_s23 }
  0x10   : > { %255 = vperm.xlu0 %463, %v252_v1   ;;  %v266_v2 = vld [vmem:[%s223_s22] sm:$0xff]  ;;  %v245_v5 = vld [vmem:[%s232_s26 + $0x8] sm:$0xff]  ;;  %v246_v6 = vld [vmem:[%s232_s26 + $0x10] sm:$0xff] }
  0x11   : > { %v244_v4 = vld [vmem:[%s232_s26] sm:$0xff]  ;;  %v247_v7 = vld [vmem:[%s232_s26 + $0x18] sm:$0xff]  ;;  %v249_v9 = vld [vmem:[%s232_s26 + $0x28] sm:$0xff] }
  0x12   : > { %v248_v8 = vld [vmem:[%s232_s26 + $0x20] sm:$0xff]  ;;  %v250_v10 = vld [vmem:[%s232_s26 + $0x30] sm:$0xff]  ;;  %v251_v11 = vld [vmem:[%s232_s26 + $0x38] sm:$0xff] }
  0x18   : > { %269 = vperm.xlu0 %463, %v266_v2  }
  0x82   : > { %v256_v3 = vpop.permute.xlu0 %255 }
  0x83   : > { %v258_v12 = vmul.f32 %v256_v3, %v244_v4  ;;  %v259_v13 = vmul.f32 %v256_v3, %v245_v5  ;;  %v260_v14 = vmul.f32 %v256_v3, %v246_v6  ;;  %v261_v15 = vmul.f32 %v256_v3, %v247_v7 }
  0x84   : > { %v262_v16 = vmul.f32 %v256_v3, %v248_v8  ;;  %v263_v17 = vmul.f32 %v256_v3, %v249_v9  ;;  %v264_v18 = vmul.f32 %v256_v3, %v250_v10  ;;  %v265_v19 = vmul.f32 %v256_v3, %v251_v11 }
  0x8a   : > { %v270_v20 = vpop.permute.xlu0 %269 }
  0x8b   : > { %v272_v21 = vadd.f32 %v270_v20, %v258_v12  ;;  %v273_v22 = vadd.f32 %v270_v20, %v259_v13  ;;  %v274_v23 = vadd.f32 %v270_v20, %v260_v14  ;;  %v275_v24 = vadd.f32 %v270_v20, %v261_v15 }
  0x8c   : > { %v276_v25 = vadd.f32 %v270_v20, %v262_v16  ;;  %v277_v26 = vadd.f32 %v270_v20, %v263_v17  ;;  %v278_v27 = vadd.f32 %v270_v20, %v264_v18  ;;  %v279_v28 = vadd.f32 %v270_v20, %v265_v19 }
  0x8d   : > { %vm280_vm0 = vcmp.ge.f32.partialorder %v272_v21, 0.0  ;;  %vm281_vm1 = vcmp.ge.f32.partialorder %v273_v22, 0.0  ;;  %vm282_vm2 = vcmp.ge.f32.partialorder %v274_v23, 0.0  ;;  %vm283_vm3 = vcmp.ge.f32.partialorder %v275_v24, 0.0 }
  0x8e   : > { %vm284_vm4 = vcmp.ge.f32.partialorder %v276_v25, 0.0  ;;  %v288_v29 = vmul.f32 0.01, %v272_v21  ;;  %v289_v30 = vmul.f32 0.01, %v273_v22  ;;  %vm285_vm5 = vcmp.ge.f32.partialorder %v277_v26, 0.0 }
  0x8f   : > { %v290_v31 = vmul.f32 0.01, %v274_v23  ;;  %v291_v32 = vmul.f32 0.01, %v275_v24  ;;  %v292_v33 = vmul.f32 0.01, %v276_v25 }
  0x90   : > { %v293_v34 = vmul.f32 0.01, %v277_v26  ;;  %v294_v35 = vmul.f32 0.01, %v278_v27  ;;  %v296_v36 = vsel %vm280_vm0, %v272_v21, %v288_v29  ;;  %v297_v37 = vsel %vm281_vm1, %v273_v22, %v289_v30 }
  0x91   : > { %vm286_vm6 = vcmp.ge.f32.partialorder %v278_v27, 0.0  ;;  %v295_v38 = vmul.f32 0.01, %v279_v28  ;;  %v298_v39 = vsel %vm282_vm2, %v274_v23, %v290_v31  ;;  %v299_v40 = vsel %vm283_vm3, %v275_v24, %v291_v32  ;;  %304 = vst [vmem:[%s242_s29] sm:$0xff] %v296_v36 }
  0x92   : > { %vm287_vm7 = vcmp.ge.f32.partialorder %v279_v28, 0.0  ;;  %v300_v41 = vsel %vm284_vm4, %v276_v25, %v292_v33  ;;  %305 = vst [vmem:[%s242_s29 + $0x8] sm:$0xff] %v297_v37  ;;  %v301_v42 = vsel %vm285_vm5, %v277_v26, %v293_v34  ;;  %v302_v43 = vsel %vm286_vm6, %v278_v27, %v294_v35 }
  0x93   : > { %306 = vst [vmem:[%s242_s29 + $0x10] sm:$0xff] %v298_v39  ;;  %v303_v44 = vsel %vm287_vm7, %v279_v28, %v295_v38 }
  0x94   : > { %307 = vst [vmem:[%s242_s29 + $0x18] sm:$0xff] %v299_v40 }
  0x95   : > { %308 = vst [vmem:[%s242_s29 + $0x20] sm:$0xff] %v300_v41 }
  0x96   : > { %309 = vst [vmem:[%s242_s29 + $0x28] sm:$0xff] %v301_v42 }
  0x97   : > { %310 = vst [vmem:[%s242_s29 + $0x30] sm:$0xff] %v302_v43 }
  0x98   : > { %311 = vst [vmem:[%s242_s29 + $0x38] sm:$0xff] %v303_v44 }
  0x99 PF: > { %s13_s14 = sadd.s32 1, %s486_s14   ;;  %s563_s12 = smov %s482_s13 }
  0x9a   : > { %p10_p5 = scmp.ge.s32.totalorder %s13_s14, 4   ;;  %s564_s13 = smov %s566_s15 }
  0x9c   :  { %12 = sbr.rel (!%p10_p5) target bundleno = 2 (0x2), region = 68 }

// kernel: conv_block_forward.2
= control target key start
LH: loop header
LB: loop body
LE: loop exit
PB: predicated region body
PF: predicated region fallthrough
CT: control target
= control target key end

     0   :  { %s1182_s24 = smov 0   ;;  %s1184_s25 = smov 0   ;;  %s1377_s0 = inlined_call_operand.vmem [shape: f32[1,128], index: 0, kind: input, shape index: {}]   ;;  %s1378_s1 = inlined_call_operand.vmem [shape: bf16[8,108], index: 1, kind: input, shape index: {}]   ;;  %s1379_s2 = inlined_call_operand.vmem [shape: f32[8,1], index: 2, kind: input, shape index: {}]   ;;  %s1380_s3 = inlined_call_operand.vmem [shape: bf16[2,10,4,150], index: 3, kind: input, shape index: {}, may-alias: {3,4,5}]   ;;  %s1381_s4 = inlined_call_operand.vmem [shape: bf16[2,10,4,150], index: 4, kind: input, shape index: {}, may-alias: {3,4,5}]   ;;  %s1382_s5 = inlined_call_operand.vmem [shape: bf16[2,10,4,150], index: 5, kind: input, shape index: {}, may-alias: {3,4,5}]   ;;  %s1383_s6 = inlined_call_operand.vmem [shape: f32[2,8,8,128], index: 6, kind: output, shape index: {0}]   ;;  %s1384_s7 = inlined_call_operand.vmem [shape: f32[2,8,8,2], index: 7, kind: output, shape index: {1}]  }
   0x1   :  { %s1186_s26 = smov 0   ;;  %s1188_s27 = smov 0  }
   0x2   :  { %s1190_s28 = smov 0  }
   0x3 LB: > { %s27_s29 = sadd.s32 1, %s1123_s26  ;;  %s30_s30 = sadd.s32 1, %s1127_s27  ;;  %s1131_s28 = sphi %s1190_s28, %s18_s28   ;;  %s1127_s27 = sphi %s1188_s27, %s1388_s27   ;;  %s1123_s26 = sphi %s1186_s26, %s1387_s26   ;;  %s1119_s25 = sphi %s1184_s25, %s1386_s25   ;;  %s1115_s24 = sphi %s1182_s24, %s1385_s24  }
   0x4   : > { %p28_p0 = scmp.ge.s32.totalorder %s27_s29, 8  ;;  %p993_p1 = scmp.ge.s32.totalorder %s1131_s28, 1 }
   0x5   : > { %p302_p2 = scmp.lt.s32.totalorder %s1131_s28, 17 }
   0x6   : > { %s1390_s29 = smov (%p28_p0, %s27_s29), 0  ;;  %s1392_s30 = smov (!%p28_p0, %s30_s30), %s1127_s27 }
   0x7   : > { %p303_p3 = pnand %p993_p1, %p302_p2  ;;  %p32_p4 = scmp.ge.s32.totalorder %s1392_s30, 2 }
   0x8   : > { %p369_p5 = scmp.lt.s32.totalorder (!%p303_p3), %s1119_s25, 1  ;;  %p371_p6 = scmp.lt.s32.totalorder (!%p303_p3), %s1115_s24, 9 }
   0x9   : > { %s1394_s30 = smov (%p32_p4, %s1392_s30), 0  ;;  %306 = sbr.rel (%p303_p3) target bundleno = 631 (0x277), region = 44 }
   0xa   : > { %s378_s16 = sadd.s32 (!%p303_p3), 1, %s1115_s24  ;;  %s1133_s23 = smov (!%p303_p3), 118  }
   0xb   : > { %p381_p7 = scmp.lt.s32.totalorder (!%p303_p3), %s378_s16, 9  ;;  %s1135_s14 = smov (!%p303_p3), 107  }
   0xc   : > { %s1138_s20 = smov (!%p303_p3), 126   ;;  %s1139_s21 = smov (!%p303_p3), 116  }
   0xd   : > { %p402_p9 = scmp.lt.s32.totalorder (!%p303_p3), %s1115_s24, 7 }
   0xe   : > { %s1396_s25 = smov (!%p369_p5, %s1119_s25), 1  ;;  %s1398_s16 = smov (!%p381_p7, %s378_s16), 9  ;;  %vm465_vm0 = vcmask 957440   ;;  %vm453_vm1 = vcmask 965632   ;;  %vm515_vm2 = vcmask 867328   ;;  %vm503_vm3 = vcmask 875520  }
   0xf   : > { %s372_s8 = scalar_select %p371_p6, %s1115_s24, 9  ;;  %vm428_vm4 = vcmask 1039360   ;;  %vm440_vm5 = vcmask 1031168   ;;  %vm478_vm6 = vcmask 949248   ;;  %vm490_vm7 = vcmask 883712  }
  0x10   : > { %s1219_s9 = smul.u32 20, %s1396_s25  ;;  %s996_s17 = sshll.u32 %s1398_s16, 1  ;;  %vm778_vm8 = vcmask 1045504   ;;  %vm803_vm11 = vcmask 7168   ;;  %vm808_vm12 = vcmask 15368  }
  0x11   : > { %s994_s10 = sshll.u32 %s372_s8, 1  ;;  %s1134_s8 = smov 117  }
  0x12   : > { %s375_s11 = sadd.s32 %s1219_s9, %s994_s10  ;;  %s385_s18 = sadd.s32 %s1219_s9, %s996_s17 }
  0x13   : > { %s995_s12 = sshll.u32 %s375_s11, 1  ;;  %s997_s19 = sshll.u32 %s385_s18, 1 }
  0x14   : > { %s1225_s15 = scalar_lea.vmem %s1380_s3, %s995_s12  ;;  %s1254_s22 = scalar_lea.vmem %s1381_s4, %s997_s19 }
  0x15   : > { %v419_v0 = vld [vmem:[%s1225_s15] sm:$0xf]  ;;  %s389_s10 = sadd.s32 2, %s1115_s24  ;;  %s1137_s19 = smov 127  }
  0x16   : > { %422 = vst [vmem:[#allocation1 + $0x1] ss:$2 sm:$0xff] %v419_v0  ;;  %v432_v1 = vld [vmem:[%s1225_s15] sm:$0xf]  ;;  %p392_p8 = scmp.lt.s32.totalorder %s389_s10, 9  ;;  %s1402_s24 = smov (!%p402_p9, %s1115_s24), 7 }
  0x17   : > { %v444_v3 = vld [vmem:[%s1225_s15] sm:$0xf] }
  0x18   : > { %v457_v5 = vld [vmem:[%s1225_s15] sm:$0xf]  ;;  %s1400_s10 = smov (!%p392_p8, %s389_s10), 9 }
  0x19   : > { %v469_v7 = vld [vmem:[%s1225_s15] sm:$0xf]  ;;  %s998_s11 = sshll.u32 %s1400_s10, 1 }
  0x1a   : > { %v482_v9 = vld [vmem:[%s1225_s15] sm:$0xf]  ;;  %s396_s12 = sadd.s32 %s1219_s9, %s998_s11  ;;  %s1136_s9 = smov 106  }
  0x1b   : > { %v494_v11 = vld [vmem:[%s1225_s15] sm:$0xf]  ;;  %s999_s13 = sshll.u32 %s396_s12, 1 }
  0x1c   : > { %v507_v13 = vld [vmem:[%s1225_s15] sm:$0xf]  ;;  %s1279_s18 = scalar_lea.vmem %s1382_s5, %s999_s13  ;;  %s1000_s13 = sshll.u32 %s1396_s25, 3 }
  0x1d   : > { %v1229_v2 = vld.sshfl [vmem:[#allocation1] sm:$0xff pattern:$0x75643120] }
  0x1e   : > { %434 = vst [vmem:[#allocation1] ss:$2 sm:$0xff] %v432_v1  ;;  %v519_v15 = vld [vmem:[%s1254_s22] sm:$0x3] }
  0x1f   : > { %v526_v17 = vld [vmem:[%s1254_s22] sm:$0xf] }
  0x20   : > { %v537_v19 = vld [vmem:[%s1254_s22] sm:$0xf] }
  0x21   : > { %v549_v21 = vld [vmem:[%s1254_s22] sm:$0xf] }
  0x22   : > { %v560_v23 = vld [vmem:[%s1254_s22] sm:$0xf] }
  0x23   : > { %v572_v25 = vld [vmem:[%s1254_s22] sm:$0xf] }
  0x24   : > { %v583_v27 = vld [vmem:[%s1254_s22] sm:$0xf] }
  0x25   : > { %v1232_v4 = vld.sshfl [vmem:[#allocation1] sm:$0xff pattern:$0x75643120] }
  0x26   : > { %447 = vst [vmem:[#allocation1 + $0x1] ss:$2 sm:$0xff] %v444_v3  ;;  %v595_v29 = vld [vmem:[%s1254_s22] sm:$0xf] }
  0x27   : > { %v606_v31 = vld [vmem:[%s1254_s22] sm:$0xf]  ;;  %s1140_s22 = smov 108  }
  0x28   : > { %v620_v33 = vld [vmem:[%s1279_s18] sm:$0xf] }
  0x29   : > { %v632_v35 = vld [vmem:[%s1279_s18] sm:$0xf] }
  0x2a   : > { %v643_v37 = vld [vmem:[%s1279_s18] sm:$0xf] }
  0x2b   : > { %v655_v39 = vld [vmem:[%s1279_s18] sm:$0xf] }
  0x2c   : > { %v666_v41 = vld [vmem:[%s1279_s18] sm:$0xf] }
  0x2d   : > { %v1235_v6 = vld.sshfl [vmem:[#allocation1] sm:$0xff pattern:$0x75643120] }
  0x2e   : > { %459 = vst [vmem:[#allocation1] ss:$2 sm:$0xff] %v457_v5  ;;  %v678_v43 = vld [vmem:[%s1279_s18] sm:$0xf] }
  0x2f   : > { %v689_v45 = vld [vmem:[%s1279_s18] sm:$0xf] }
  0x30   : > { %v701_v47 = vld [vmem:[%s1279_s18] sm:$0xf] }
  0x31   : > { %v618_v3 = vld [vmem:[%s1279_s18] sm:$0x3] }
  0x32   : > { %619 = vst [vmem:[#allocation2 + $0x24] sm:$0x3] %v618_v3 }
  0x35   : > { %v1238_v8 = vld.sshfl [vmem:[#allocation1] sm:$0xff pattern:$0x75643120] }
  0x36   : > { %472 = vst [vmem:[#allocation1 + $0x1] ss:$2 sm:$0xff] %v469_v7 }
  0x3d   : > { %v1242_v10 = vld.sshfl [vmem:[#allocation1] sm:$0xff pattern:$0x75643120] }
  0x3e   : > { %484 = vst [vmem:[#allocation1] ss:$2 sm:$0xff] %v482_v9 }
  0x45   : > { %v1245_v12 = vld.sshfl [vmem:[#allocation1] sm:$0xff pattern:$0x75643120] }
  0x46   : > { %497 = vst [vmem:[#allocation1 + $0x1] ss:$2 sm:$0xff] %v494_v11 }
  0x4d   : > { %v1249_v14 = vld.sshfl [vmem:[#allocation1] sm:$0xff pattern:$0x75643120] }
  0x4e   : > { %509 = vst [vmem:[#allocation1] ss:$2 sm:$0xff] %v507_v13 }
  0x55   : > { %v1257_v16 = vld.sshfl [vmem:[#allocation1] sm:$0xff pattern:$0x75643120] }
  0x56   : > { %522 = vst [vmem:[#allocation1 + $0x1] ss:$2 sm:$0xff] %v519_v15 }
  0x5d   : > { %v523_v18 = vld.sshfl [vmem:[#allocation1] sm:$0xff pattern:$0x75643120] }
  0x5e   : > { %528 = vst [vmem:[#allocation1] ss:$2 sm:$0xff] %v526_v17 }
  0x5f   : > { %525 = vst [vmem:[#allocation2 + $0x10] sm:$0xc] %v523_v18 }
  0x65   : > { %v1261_v20 = vld.sshfl [vmem:[#allocation1] sm:$0xff pattern:$0x75643120] }
  0x66   : > { %540 = vst [vmem:[#allocation1 + $0x1] ss:$2 sm:$0xff] %v537_v19 }
  0x6d   : > { %v1264_v22 = vld.sshfl [vmem:[#allocation1] sm:$0xff pattern:$0x75643120] }
  0x6e   : > { %551 = vst [vmem:[#allocation1] ss:$2 sm:$0xff] %v549_v21 }
  0x75   : > { %v552_v24 = vld.sshfl [vmem:[#allocation1] sm:$0xff pattern:$0x75643120] }
  0x76   : > { %554 = vrot.lane.b32.xlu1 %v552_v24, %s1133_s23  ;;  %563 = vst [vmem:[#allocation1 + $0x1] ss:$2 sm:$0xff] %v560_v23 }
  0x7d   : > { %v564_v26 = vld.sshfl [vmem:[#allocation1] sm:$0xff pattern:$0x75643120] }
  0x7e   : > { %574 = vst [vmem:[#allocation1] ss:$2 sm:$0xff] %v572_v25  ;;  %566 = vrot.lane.b32.xlu2 %v564_v26, %s1134_s8 }
  0x85   : > { %v575_v28 = vld.sshfl [vmem:[#allocation1] sm:$0xff pattern:$0x75643120] }
  0x86   : > { %586 = vst [vmem:[#allocation1 + $0x1] ss:$2 sm:$0xff] %v583_v27 }
  0x8d   : > { %v587_v30 = vld.sshfl [vmem:[#allocation1] sm:$0xff pattern:$0x75643120] }
  0x8e   : > { %597 = vst [vmem:[#allocation1] ss:$2 sm:$0xff] %v595_v29 }
  0x95   : > { %v598_v32 = vld.sshfl [vmem:[#allocation1] sm:$0xff pattern:$0x75643120] }
  0x96   : > { %609 = vst [vmem:[#allocation1 + $0x1] ss:$2 sm:$0xff] %v606_v31  ;;  %600 = vrot.lane.b32.xlu1 %v598_v32, %s1135_s14 }
  0x9d   : > { %v610_v34 = vld.sshfl [vmem:[#allocation1] sm:$0xff pattern:$0x75643120] }
  0x9e   : > { %623 = vst [vmem:[#allocation1 + $0x1] ss:$2 sm:$0xff] %v620_v33  ;;  %612 = vrot.lane.b32.xlu2 %v610_v34, %s1136_s9 }
  0xa5   : > { %v624_v36 = vld.sshfl [vmem:[#allocation1] sm:$0xff pattern:$0x75643120] }
  0xa6   : > { %626 = vrot.lane.b32.xlu0 %v624_v36, %s1137_s19  ;;  %634 = vst [vmem:[#allocation1] ss:$2 sm:$0xff] %v632_v35 }
  0xad   : > { %v635_v38 = vld.sshfl [vmem:[#allocation1] sm:$0xff pattern:$0x75643120] }
  0xae   : > { %646 = vst [vmem:[#allocation1 + $0x1] ss:$2 sm:$0xff] %v643_v37  ;;  %637 = vrot.lane.b32.xlu1 %v635_v38, %s1138_s20  ;;  %v417_v38 = vld [vmem:[%s1225_s15] sm:$0x3] }
  0xaf   : > { %418 = vst [vmem:[#allocation2] sm:$0x3] %v417_v38 }
  0xb5   : > { %v647_v40 = vld.sshfl [vmem:[#allocation1] sm:$0xff pattern:$0x75643120] }
  0xb6   : > { %657 = vst [vmem:[#allocation1] ss:$2 sm:$0xff] %v655_v39  ;;  %649 = vrot.lane.b32.xlu2 %v647_v40, %s1133_s23 }
  0xbd   : > { %v658_v42 = vld.sshfl [vmem:[#allocation1] sm:$0xff pattern:$0x75643120] }
  0xbe   : > { %669 = vst [vmem:[#allocation1 + $0x1] ss:$2 sm:$0xff] %v666_v41  ;;  %660 = vrot.lane.b32.xlu2 %v658_v42, %s1134_s8 }
  0xc5   : > { %v670_v44 = vld.sshfl [vmem:[#allocation1] sm:$0xff pattern:$0x75643120] }
  0xc6   : > { %672 = vrot.lane.b32.xlu0 %v670_v44, %s1139_s21  ;;  %680 = vst [vmem:[#allocation1] ss:$2 sm:$0xff] %v678_v43  ;;  %512 = vrot.lane.b32.xlu2 %v1257_v16, %s1136_s9 }
  0xcd   : > { %v681_v46 = vld.sshfl [vmem:[#allocation1] sm:$0xff pattern:$0x75643120] }
  0xce   : > { %683 = vrot.lane.b32.xlu0 %v681_v46, %s1140_s22  ;;  %692 = vst [vmem:[#allocation1 + $0x1] ss:$2 sm:$0xff] %v689_v45  ;;  %462 = vrot.lane.b32.xlu2 %v1238_v8, %s1134_s8 }
  0xd5   : > { %v693_v48 = vld.sshfl [vmem:[#allocation1] sm:$0xff pattern:$0x75643120] }
  0xd6   : > { %695 = vrot.lane.b32.xlu0 %v693_v48, %s1135_s14  ;;  %703 = vst [vmem:[#allocation1] ss:$2 sm:$0xff] %v701_v47  ;;  %500 = vrot.lane.b32.xlu2 %v1249_v14, %s1135_s14  ;;  %s405_s14 = sadd.s32 %s1000_s13, %s1402_s24 }
  0xd7   : > { %s1001_s16 = sshll.u32 %s405_s14, 3 }
  0xd8   : > { %v567_v50 = vpop.permute.xlu2 %566  ;;  %s415_s24 = scalar_lea.vmem %s1384_s7, %s1001_s16 }
  0xd9   : > { %v568_v51 = vrot.slane %v567_v50, 4 }
  0xdb   : > { %v569_v52 = vsel %vm465_vm0, %v567_v50, %v568_v51  ;;  %v727_v51 = vld [vmem:[%s1379_s2] sm:$0xff] }
  0xdc   : > { %571 = vst [vmem:[#allocation2 + $0x18] sm:$0xc] %v569_v52 }
  0xdd   : > { %v704_v49 = vld.sshfl [vmem:[#allocation1] sm:$0xff pattern:$0x75643120] }
  0xde   : > { %577 = vrot.lane.b32.xlu0 %v575_v28, %s1139_s21  ;;  %706 = vrot.lane.b32.xlu1 %v704_v49, %s1136_s9  ;;  %s407_s9 = scalar_lea.vmem %s1383_s6, %s1001_s16 }
  0xdf   : > { %450 = vrot.lane.b32.xlu2 %v1235_v6, %s1133_s23 }
  0xe6   : > { %531 = vrot.lane.b32.xlu0 %v1261_v20, %s1137_s19  ;;  %589 = vrot.lane.b32.xlu1 %v587_v30, %s1140_s22 }
  0xe8   : > { %v555_v53 = vpop.permute.xlu1 %554 }
  0xe9   : > { %v556_v54 = vrot.slane %v555_v53, 4 }
  0xeb   : > { %v557_v55 = vsel %vm453_vm1, %v555_v53, %v556_v54  ;;  %v1141_v54 = vmov 0  }
  0xec   : > { %559 = vst [vmem:[#allocation2 + $0x18] sm:$0x3] %v557_v55  ;;  %1092 = vset.pattern.permute.xlu0 %v1141_v54 }
  0xee   : > { %475 = vrot.lane.b32.xlu0 %v1242_v10, %s1139_s21  ;;  %543 = vrot.lane.b32.xlu1 %v1264_v22, %s1138_s20 }
  0xf6   : > { %487 = vrot.lane.b32.xlu1 %v1245_v12, %s1140_s22  ;;  %425 = vrot.lane.b32.xlu0 %v1229_v2, %s1137_s19 }
  0xf8   : > { %v613_v56 = vpop.permute.xlu2 %612 }
  0xf9   : > { %v614_v57 = vrot.slane %v613_v56, 4 }
  0xfb   : > { %v615_v58 = vsel %vm515_vm2, %v613_v56, %v614_v57 }
  0xfc   : > { %617 = vst [vmem:[#allocation2 + $0x20] sm:$0xc] %v615_v58 }
  0xfe   : > { %437 = vrot.lane.b32.xlu1 %v1232_v4, %s1138_s20  ;;  %730 = vperm.xlu0 %1092, %v727_v51  }
 0x108   : > { %v601_v59 = vpop.permute.xlu1 %600 }
 0x109   : > { %v602_v60 = vrot.slane %v601_v59, 4 }
 0x10b   : > { %v603_v61 = vsel %vm503_vm3, %v601_v59, %v602_v60 }
 0x10c   : > { %605 = vst [vmem:[#allocation2 + $0x20] sm:$0x3] %v603_v61 }
 0x110   : > { %v650_v62 = vpop.permute.xlu2 %649 }
 0x111   : > { %v651_v63 = vrot.slane %v650_v62, 4 }
 0x113   : > { %v652_v0 = vsel %vm453_vm1, %v650_v62, %v651_v63 }
 0x114   : > { %654 = vst [vmem:[#allocation2 + $0x28] sm:$0xc] %v652_v0 }
 0x118   : > { %v627_v1 = vpop.permute.xlu0 %626  ;;  %v661_v4 = vpop.permute.xlu2 %660 }
 0x119   : > { %v628_v2 = vrot.slane %v627_v1, 4  ;;  %v662_v6 = vrot.slane %v661_v4, 4 }
 0x11b   : > { %v629_v5 = vsel %vm428_vm4, %v627_v1, %v628_v2  ;;  %v663_v7 = vsel %vm465_vm0, %v661_v4, %v662_v6 }
 0x11c   : > { %631 = vst [vmem:[#allocation2 + $0x24] sm:$0xc] %v629_v5 }
 0x11d   : > { %665 = vst [vmem:[#allocation2 + $0x2c] sm:$0x3] %v663_v7 }
 0x120   : > { %v638_v8 = vpop.permute.xlu1 %637  ;;  %v513_v11 = vpop.permute.xlu2 %512 }
 0x121   : > { %v639_v9 = vrot.slane %v638_v8, 4  ;;  %v514_v12 = vrot.slane %v513_v11, 4 }
 0x123   : > { %v640_v10 = vsel %vm440_vm5, %v638_v8, %v639_v9  ;;  %v516_v14 = vsel %vm515_vm2, %v513_v11, %v514_v12  ;;  %v1039_v58 = vld [vmem:[#allocation2 + $0x20] sm:$0xff]  ;;  %v712_v8 = vld [vmem:[%s1378_s1] sm:$0xf] }
 0x124   : > { %642 = vst [vmem:[#allocation2 + $0x28] sm:$0x3] %v640_v10  ;;  %v795_v9 = vld [vmem:[%s1377_s0] sm:$0x1] }
 0x125   : > { %518 = vst [vmem:[#allocation2 + $0x10] sm:$0x3] %v516_v14  ;;  %vm796_vm9 = vcmp.gt.f32.partialorder %v795_v9, 0.5 }
 0x126   : > { %v797_v10 = vsel %vm796_vm9, 1, %v1141_v54 }
 0x127   : > { %v798_v11 = vperm.slane %v797_v10, 0 }
 0x128   : > { %v463_v17 = vpop.permute.xlu2 %462 }
 0x129   : > { %v464_v18 = vrot.slane %v463_v17, 4  ;;  %vm799_vm10 = vcmp.eq.s32.totalorder %v798_v11, 1 }
 0x12b   : > { %v466_v20 = vsel %vm465_vm0, %v463_v17, %v464_v18 }
 0x12c   : > { %468 = vst [vmem:[#allocation2 + $0x8] sm:$0x3] %v466_v20 }
 0x130   : > { %v501_v23 = vpop.permute.xlu2 %500 }
 0x131   : > { %v502_v24 = vrot.slane %v501_v23, 4 }
 0x133   : > { %v504_v26 = vsel %vm503_vm3, %v501_v23, %v502_v24 }
 0x134   : > { %506 = vst [vmem:[#allocation2 + $0xc] sm:$0xc] %v504_v26 }
 0x138   : > { %v673_v13 = vpop.permute.xlu0 %672 }
 0x139   : > { %v674_v15 = vrot.slane %v673_v13, 4  ;;  %v451_v29 = vpop.permute.xlu2 %450 }
 0x13a   : > { %v452_v30 = vrot.slane %v451_v29, 4 }
 0x13b   : > { %v675_v16 = vsel %vm478_vm6, %v673_v13, %v674_v15 }
 0x13c   : > { %677 = vst [vmem:[#allocation2 + $0x2c] sm:$0xc] %v675_v16  ;;  %v454_v33 = vsel %vm453_vm1, %v451_v29, %v452_v30 }
 0x13d   : > { %456 = vst [vmem:[#allocation2 + $0x4] sm:$0xc] %v454_v33 }
 0x140   : > { %v684_v19 = vpop.permute.xlu0 %683 }
 0x141   : > { %v685_v21 = vrot.slane %v684_v19, 4 }
 0x143   : > { %v686_v22 = vsel %vm490_vm7, %v684_v19, %v685_v21  ;;  %v1040_v55 = vld [vmem:[#allocation2 + $0x28] sm:$0xff] }
 0x144   : > { %688 = vst [vmem:[#allocation2 + $0x30] sm:$0x3] %v686_v22 }
 0x148   : > { %v696_v25 = vpop.permute.xlu0 %695 }
 0x149   : > { %v697_v27 = vrot.slane %v696_v25, 4 }
 0x14b   : > { %v698_v28 = vsel %vm503_vm3, %v696_v25, %v697_v27 }
 0x14c   : > { %700 = vst [vmem:[#allocation2 + $0x30] sm:$0xc] %v698_v28 }
 0x150   : > { %v578_v31 = vpop.permute.xlu0 %577  ;;  %v707_v32 = vpop.permute.xlu1 %706 }
 0x151   : > { %v579_v34 = vrot.slane %v578_v31, 4  ;;  %v708_v35 = vrot.slane %v707_v32, 4 }
 0x153   : > { %v580_v36 = vsel %vm478_vm6, %v578_v31, %v579_v34  ;;  %v709_v37 = vsel %vm515_vm2, %v707_v32, %v708_v35  ;;  %v1030_v45 = vld [vmem:[#allocation2 + $0x30] sm:$0xf] }
 0x154   : > { %582 = vst [vmem:[#allocation2 + $0x1c] sm:$0x3] %v580_v36 }
 0x155   : > { %711 = vst [vmem:[#allocation2 + $0x34] sm:$0x3] %v709_v37 }
 0x158   : > { %v532_v39 = vpop.permute.xlu0 %531  ;;  %v590_v40 = vpop.permute.xlu1 %589 }
 0x159   : > { %v533_v41 = vrot.slane %v532_v39, 4  ;;  %v591_v42 = vrot.slane %v590_v40, 4 }
 0x15b   : > { %v534_v43 = vsel %vm428_vm4, %v532_v39, %v533_v41  ;;  %v592_v44 = vsel %vm490_vm7, %v590_v40, %v591_v42 }
 0x15c   : > { %536 = vst [vmem:[#allocation2 + $0x14] sm:$0x3] %v534_v43  ;;  %v1041_v46 = vld [vmem:[#allocation2 + $0x30] sm:$0x30] }
 0x15d   : > { %594 = vst [vmem:[#allocation2 + $0x1c] sm:$0xc] %v592_v44  ;;  %v1031_v47 = vor.u32 %v1041_v46, %v1030_v45 }
 0x15f   : > { %v780_v48 = vsel %vm778_vm8, %v1031_v47, 0 }
 0x160   : > { %783 = vmatpush.bf16.msra.mxu0 %v780_v48  ;;  %v476_v49 = vpop.permute.xlu0 %475  ;;  %v544_v50 = vpop.permute.xlu1 %543 }
 0x161   : > { %v477_v52 = vrot.slane %v476_v49, 4  ;;  %v545_v53 = vrot.slane %v544_v50, 4 }
 0x163   : > { %v479_v56 = vsel %vm478_vm6, %v476_v49, %v477_v52  ;;  %v546_v57 = vsel %vm440_vm5, %v544_v50, %v545_v53 }
 0x164   : > { %481 = vst [vmem:[#allocation2 + $0x8] sm:$0xc] %v479_v56  ;;  %784 = vmatpush.bf16.msra.mxu0 %v1040_v55  ;;  %v1038_v63 = vld [vmem:[#allocation2 + $0x18] sm:$0xff] }
 0x165   : > { %548 = vst [vmem:[#allocation2 + $0x14] sm:$0xc] %v546_v57 }
 0x168   : > { %785 = vmatpush.bf16.msra.mxu0 %v1039_v58  ;;  %v488_v59 = vpop.permute.xlu1 %487  ;;  %v426_v60 = vpop.permute.xlu0 %425 }
 0x169   : > { %v489_v61 = vrot.slane %v488_v59, 4  ;;  %v427_v62 = vrot.slane %v426_v60, 4 }
 0x16b   : > { %v491_v0 = vsel %vm490_vm7, %v488_v59, %v489_v61  ;;  %v429_v1 = vsel %vm428_vm4, %v426_v60, %v427_v62 }
 0x16c   : > { %493 = vst [vmem:[#allocation2 + $0xc] sm:$0x3] %v491_v0  ;;  %786 = vmatpush.bf16.msra.mxu0 %v1038_v63  ;;  %v1037_v2 = vld [vmem:[#allocation2 + $0x10] sm:$0xff] }
 0x16d   : > { %431 = vst [vmem:[#allocation2] sm:$0xc] %v429_v1 }
 0x170   : > { %787 = vmatpush.bf16.msra.mxu0 %v1037_v2  ;;  %v438_v3 = vpop.permute.xlu1 %437  ;;  %v731_v12 = vpop.permute.xlu0 %730 }
 0x171   : > { %v439_v5 = vrot.slane %v438_v3, 4 }
 0x173   : > { %v441_v4 = vsel %vm440_vm5, %v438_v3, %v439_v5  ;;  %v1036_v6 = vld [vmem:[#allocation2 + $0x8] sm:$0xff] }
 0x174   : > { %443 = vst [vmem:[#allocation2 + $0x4] sm:$0x3] %v441_v4  ;;  %788 = vmatpush.bf16.msra.mxu0 %v1036_v6 }
 0x17b   : > { %v1035_v7 = vld [vmem:[#allocation2] sm:$0xff] }
 0x17c   : > { %789 = vmatpush.bf16.msra.mxu0 %v1035_v7 }
 0x17f   : > { %1032 = vmatmul.msk.bf16.vlgmr.msra.gmra.mxu0 %vm490_vm7, %v712_v8 }
 0x1fc   : > { %v791_v13 = vpop.f32.mrf.mxu0 }
 0x1fd   : > { %v792_v14 = vadd.f32 %v791_v13, %v731_v12 }
 0x1ff   : > { %810 = vst [vmem:[%s407_s9] sm:$0xff] %v792_v14  ;;  %v800_v15 = vsel %vm799_vm10, %v792_v14, 0.0 }
 0x200   : > { %801 = vadd.xlane.f32.xlu1 %v800_v15  ;;  %v805_v16 = vmul.f32 %v800_v15, %v792_v14 }
 0x202   : > { %806 = vadd.xlane.f32.xlu2 %v805_v16 }
 0x204   : > { %v793_v17 = vpop.f32.mrf.mxu0 }
 0x273   : > { %v802_v18 = vpop.xlane.xlu1 %801 }
 0x274   : > { %804 = vst.msk [vmem:[%s415_s24] sm:$0xff] %vm803_vm11, %v802_v18 }
 0x275   : > { %v807_v19 = vpop.xlane.xlu2 %806 }
 0x276   : > { %809 = vst.msk [vmem:[%s415_s24] sm:$0xff] %vm808_vm12, %v807_v19 }
 0x277 PF: > { %s18_s28 = sadd.s32 1, %s1131_s28   ;;  %s1385_s24 = smov %s1123_s26 }
 0x278   : > { %p15_p10 = scmp.ge.s32.totalorder %s18_s28, 18   ;;  %s1386_s25 = smov %s1127_s27 }
 0x279   : > { %s1387_s26 = smov %s1390_s29  ;;  %s1388_s27 = smov %s1394_s30 }
 0x27a   :  { %17 = sbr.rel (!%p15_p10) target bundleno = 3 (0x3), region = 105 }

</bundles_post_ra>
